<compile_context>
chip_gen: v6e
topology: v6e:2x2x1
jax: 0.10.0
libtpu: 0.0.40
codegen_flags: <defaults>
</compile_context>

<pallas_src>
import numpy as np
import jax
import jax.numpy as jnp
from jax.experimental import pallas as pl
from jax.experimental.pallas import tpu as pltpu


def _identity_copy_kernel(p_ref, o_ref):
    # Straight vreg copy of the current (lane-dense) block.
    o_ref[...] = p_ref[...]


def implicit_forward(implicit):
    """Forward of ImplicitM: returns the implicit parameter (identity copy
    routed through a Pallas kernel).

    implicit: (1, C, 1, 1) array.
    """
    N, C, H, W = implicit.shape  # N == H == W == 1 for this module
    # Lane-dense view: merge everything after the batch dim onto the lane axis.
    flat = implicit.reshape(N, C * H * W)
    L = flat.shape[-1]

    LANE_TILE = 1024  # elements per grid step; multiple of 128, tiny vs VMEM

    if L > LANE_TILE and L % LANE_TILE == 0:
        # Tiled, pipelined copy for large parameters.
        spec = pl.BlockSpec((N, LANE_TILE), lambda i: (0, i))
        out = pl.pallas_call(
            _identity_copy_kernel,
            out_shape=jax.ShapeDtypeStruct(flat.shape, flat.dtype),
            grid=(L // LANE_TILE,),
            in_specs=[spec],
            out_specs=spec,
            compiler_params=pltpu.CompilerParams(
                dimension_semantics=("parallel",)),
        )(flat)
    else:
        # Small parameter: whole-array block, single grid point.
        out = pl.pallas_call(
            _identity_copy_kernel,
            out_shape=jax.ShapeDtypeStruct(flat.shape, flat.dtype),
            grid=(1,),
            in_specs=[pl.BlockSpec(flat.shape, lambda i: (0, 0))],
            out_specs=pl.BlockSpec(flat.shape, lambda i: (0, 0)),
        )(flat)

    return out.reshape(N, C, H, W)


class ImplicitM:
    """JAX/Pallas equivalent of ImplicitM."""

    def __init__(self, channel, key=None):
        self.channel = channel
        if key is None:
            key = jax.random.PRNGKey(0)
        # nn.init.normal_(mean=1.0, std=0.02) on a (1, channel, 1, 1) parameter.
        self.implicit = (1.0 + 0.02 * jax.random.normal(
            key, (1, channel, 1, 1), dtype=jnp.float32))

    def __call__(self):
        # forward() takes no inputs and returns the implicit parameter.
        return implicit_forward(self.implicit)


if __name__ == "__main__":
    key = jax.random.PRNGKey(0)
    k_small, k_big = jax.random.split(key, 2)

    # Small, module-consistent shape: channel = 4 -> parameter (1, 4, 1, 1).
    mod = ImplicitM(channel=4, key=k_small)
    out = jax.block_until_ready(mod())
    assert out.shape == (1, 4, 1, 1)
    assert out.dtype == mod.implicit.dtype
    assert np.allclose(np.asarray(out), np.asarray(mod.implicit)), \
        "ImplicitM forward mismatch (small)"

    # Larger channel count exercises the tiled / pipelined lane-dense path.
    mod_big = ImplicitM(channel=2048, key=k_big)
    out_big = jax.block_until_ready(mod_big())
    assert out_big.shape == (1, 2048, 1, 1)
    assert np.allclose(np.asarray(out_big), np.asarray(mod_big.implicit)), \
        "ImplicitM forward mismatch (tiled)"

    print("KERNEL_OK")
</pallas_src>

<mosaic_0001>
module attributes {stable_mosaic.version = 11 : i64} {
  func.func @_identity_copy_kernel(%arg0: i32, %arg1: memref<1x4xf32, #tpu.memory_space<vmem>>, %arg2: memref<1x4xf32, #tpu.memory_space<vmem>>) attributes {dimension_semantics = [#tpu.dimension_semantics<arbitrary>], iteration_bounds = array<i64: 1>, scalar_prefetch = 0 : i64, scratch_operands = 0 : i64, tpu.core_type = #tpu.core_type<tc>, window_params = [{pipeline_mode = #tpu.pipeline_mode<synchronous>, transform_indices = @transform_0, window_bounds = array<i64: 1, 4>}, {pipeline_mode = #tpu.pipeline_mode<synchronous>, transform_indices = @transform_1, window_bounds = array<i64: 1, 4>}]} {
    %c0 = arith.constant 0 : index
    %c0_0 = arith.constant 0 : index
    %0 = vector.load %arg1[%c0, %c0_0] : memref<1x4xf32, #tpu.memory_space<vmem>>, vector<1x4xf32>
    %c0_1 = arith.constant 0 : index
    %c0_2 = arith.constant 0 : index
    %1 = vector.load %arg2[%c0_1, %c0_2] : memref<1x4xf32, #tpu.memory_space<vmem>>, vector<1x4xf32>
    tpu.vector_store %arg2[%c0_1, %c0_2], %0 {strides = array<i32>} : memref<1x4xf32, #tpu.memory_space<vmem>>, vector<1x4xf32>,
    return
  }
  func.func @transform_0(%arg0: i32) -> (i32, i32) {
    %c0_i32 = arith.constant 0 : i32
    %c0_i32_0 = arith.constant 0 : i32
    %c0_i32_1 = arith.constant 0 : i32
    return %c0_i32, %c0_i32_0 : i32, i32
  }
  func.func @transform_1(%arg0: i32) -> (i32, i32) {
    %c0_i32 = arith.constant 0 : i32
    %c0_i32_0 = arith.constant 0 : i32
    %c0_i32_1 = arith.constant 0 : i32
    return %c0_i32, %c0_i32_0 : i32, i32
  }
}

</mosaic_0001>

<bundles_post_ra>
// kernel: tpu_custom_call.1
= control target key start
LH: loop header
LB: loop body
LE: loop exit
PB: predicated region body
PF: predicated region fallthrough
CT: control target
= control target key end

     0   :  { %6 = vsyncpa [#allocation3], 0  ;;  %s103_s0 = inlined_call_operand.hbm [shape: f32[1,4], index: 0, kind: input, shape index: {}]   ;;  %s104_s1 = inlined_call_operand.hbm [shape: f32[1,4], index: 1, kind: output, shape index: {}]  }
   0x1   :  { %7 = vsyncpa [#allocation4], 0  ;;  %s85_s6 = smov [#allocation2]  }
   0x2   :  { %s14_s7 = sshll.u32 %s85_s6, 4  ;;  %s15_s7 = int_to_ptr.vmem [resolvable:$true] %s14_s7 }
   0x3   :  { %s49_s8 = scalar_lea.vmem %s15_s7, 16  ;;  %s53_s9 = scalar_lea.vmem %s15_s7, 32 }
   0x4   :  { %p50_p0 = scmp.ne.s32.totalorder %s15_s7, %s49_s8  ;;  %p54_p1 = scmp.lt.s32.totalorder %s15_s7, %s15_s7 }
   0x5   :  { %p55_p2 = scmp.lt.s32.totalorder %s53_s9, %s49_s8 }
   0x7   :  { %p56_p3 = por %p55_p2, %p54_p1 }
   0x9   :  { %p57_p4 = pnand %p56_p3, %p50_p0 }
   0xb   :  { %60 = shalt.err (!%p57_p4)
}
   0xc   :  { %17 = dma.hbm_to_vmem [thread:$0]  %s103_s0, 16, %s15_s7, [#allocation3]  }
   0xd   :  { %81 = dma.done.wait [#allocation3], 16  }
   0xe   :  { %82 = vsyncadd [#allocation3], 4294967280  ;;  %s86_s12 = smov [#allocation5]   ;;  %vm22_vm0 = vcmask 24576   ;;  %v21_v0 = vld [vmem:[#allocation2] sm:$0x1] }
   0xf   :  { %s30_s13 = sshll.u32 %s86_s12, 4  ;;  %23 = vst.msk [vmem:[#allocation5] sm:$0x1] %vm22_vm0, %v21_v0  ;;  %s31_s13 = int_to_ptr.vmem [resolvable:$true] %s30_s13 }
  0x10   :  { %s61_s14 = scalar_lea.vmem %s31_s13, 16  ;;  %s65_s15 = scalar_lea.vmem %s31_s13, 32 }
  0x11   :  { %p62_p5 = scmp.ne.s32.totalorder %s31_s13, %s61_s14  ;;  %p66_p6 = scmp.lt.s32.totalorder %s31_s13, %s31_s13 }
  0x12   :  { %p67_p7 = scmp.lt.s32.totalorder %s65_s15, %s61_s14 }
  0x14   :  { %p68_p8 = por %p67_p7, %p66_p6 }
  0x16   :  { %p69_p9 = pnand %p68_p8, %p62_p5 }
  0x18   :  { %72 = shalt.err (!%p69_p9)
}
  0x19   :  { %33 = dma.vmem_to_hbm [thread:$0]  %s31_s13, 16, %s104_s1, [#allocation4]  }
  0x1a   :  { %83 = dma.done.wait [#allocation4], 16  }
  0x1b   :  { %84 = vsyncadd [#allocation4], 4294967280 }
  0x1c   :  { %37 = vsyncpa [#allocation3], 1 }
  0x1d   :  { %38 = vsyncpa [#allocation4], 1 }

</bundles_post_ra>
